<compile_context>
chip_gen: v6e
topology: v6e:2x2x1
jax: 0.10.0
libtpu: 0.0.40
codegen_flags: <defaults>
</compile_context>

<pallas_src>
import functools

import jax
import jax.numpy as jnp
from jax import lax
from jax.experimental import pallas as pl
from jax.experimental.pallas import tpu as pltpu


def _round_up(x, m):
    return ((x + m - 1) // m) * m


def _nearest_subspace_kernel(xt_ref, ut_ref, out_ref, best_ref, *,
                             cbi, kp, cpo, n_inner, unroll):
    """Grid = (N_tiles, U_chunks). Axis 1 (class chunks) is the reduction axis; the
    fine-grained class sweep runs in-kernel over the (resident) ut chunk."""
    c = pl.program_id(1)

    @pl.when(c == 0)
    def _():
        # -inf init + strict '>' updates below (no duplicated cold path).
        best_ref[...] = jnp.full_like(best_ref, -jnp.inf)
        out_ref[...] = jnp.zeros_like(out_ref)

    x = xt_ref[...]                       # (D, TN), compute dtype (bf16 by default)
    tn = x.shape[1]
    rows = cbi * kp                       # matmul M dim per inner step (~256)
    base_c = c * cpo                      # first class id of this U chunk
    # Hoisted out of the loop (JAX does not CSE broadcast_in_dim).
    iota_c = lax.broadcasted_iota(jnp.int32, (cbi, tn), 0)
    big = jnp.iinfo(jnp.int32).max

    def body(b, carry):
        start = pl.multiple_of(b * rows, rows)
        u_blk = ut_ref[pl.ds(start, rows), :]                        # (rows, D)
        # (rows, D) @ (D, TN) -> (rows, TN); f32 accumulation on the MXU.
        proj = jnp.dot(u_blk, x, preferred_element_type=jnp.float32)
        # Per-class energy ||(x-m) U_c||^2 via sublane-aligned reshape+sum
        # (kp is a multiple of the sublane packing, so no extra MXU pass needed).
        energy = (proj * proj).reshape(cbi, kp, tn).sum(axis=1)      # (cbi, TN)
        ids = iota_c + (base_c + b * cbi)
        # Vectorized block argmax with first-occurrence (min class id) tie-break.
        e_max = jnp.max(energy, axis=0, keepdims=True)               # (1, TN)
        id_best = jnp.min(jnp.where(energy == e_max, ids, big),
                          axis=0, keepdims=True)                     # (1, TN)
        # Strict '>' against the running best keeps first-occurrence semantics across
        # blocks/chunks (classes are visited in ascending order).
        better = e_max > best_ref[...]
        best_ref[...] = jnp.where(better, e_max, best_ref[...])
        out_ref[...] = jnp.where(better, id_best, out_ref[...])
        return carry

    lax.fori_loop(0, n_inner, body, 0, unroll=unroll)


def fast_nearest_subspace_predict(features, feat_mean, u_factors, *,
                                  tn=512, mxu_rows=256,
                                  compute_dtype=jnp.bfloat16,
                                  ut_vmem_budget_bytes=28 * 1024 * 1024):
    """features: (N, D); feat_mean: (D,); u_factors: (C, D, K) top-k eigvecs.

    Returns int32 (N,) predicted class indices (== torch argmin over the
    subspace-projection residual norms). compute_dtype=bf16 (default) halves HBM
    traffic and uses the native MXU path; energy accumulation stays f32.
    """
    N, D = features.shape
    C, d2, K = u_factors.shape
    assert d2 == D and feat_mean.shape == (D,)

    itemsize = jnp.dtype(compute_dtype).itemsize
    sub = max(8, 32 // itemsize)            # sublane packing: 8 for f32, 16 for bf16
    kp = _round_up(K, sub)
    cbi = max(1, mxu_rows // kp)            # classes per inner matmul (~256 MXU rows)
    rows = cbi * kp

    # Lane tiling: tn multiple of 128, capped for small N; prefer >=2 N tiles so the
    # v7x megacore can shard the parallel axis across both TensorCores.
    n_lanes = _round_up(max(N, 1), 128)
    tn_eff = min(_round_up(tn, 128), n_lanes)
    if n_lanes // tn_eff < 2 and n_lanes >= 256:
        tn_eff = _round_up(n_lanes // 2, 128)
    n_pad = _round_up(n_lanes, tn_eff)
    n_tiles = n_pad // tn_eff

    # Class padding + outer chunking: keep U resident in VMEM when it fits the budget
    # (n_outer == 1  =>  U is DMA'd exactly once for the whole kernel); otherwise
    # stream chunks of cpo classes per grid step.
    c_pad = _round_up(C, cbi)
    full_u_bytes = c_pad * kp * D * itemsize
    n_outer = max(1, -(-2 * full_u_bytes // ut_vmem_budget_bytes))  # 2x: double-buffered
    cpo = _round_up(-(-c_pad // n_outer), cbi)
    c_pad = _round_up(c_pad, cpo)
    n_outer = c_pad // cpo
    n_inner = cpo // cbi

    # Hoisted centering + transpose (samples -> lanes); zero-pad extra samples.
    xc = features.astype(jnp.float32) - feat_mean.astype(jnp.float32)[None, :]
    xt = jnp.zeros((D, n_pad), compute_dtype).at[:, :N].set(xc.T.astype(compute_dtype))

    # Pack U^T factors: (C, D, K) -> (c_pad, kp, D) -> (c_pad*kp, D). Padded rows are 0
    # so they add nothing to the energy; padded classes can never strictly win, and on
    # exact ties the min-id / strict-'>' rules pick the real (lower-index) class first.
    u = jnp.zeros((c_pad, D, kp), compute_dtype).at[:C, :, :K].set(
        u_factors.astype(compute_dtype))
    ut = jnp.transpose(u, (0, 2, 1)).reshape(c_pad * kp, D)

    # VMEM footprint -> vmem limit with headroom (v7x has only 64 MiB physical).
    ut_block = cpo * kp * D * itemsize
    xt_block = D * tn_eff * itemsize
    proj_bytes = rows * tn_eff * 4
    footprint = (2 * ut_block + 2 * xt_block + 2 * (tn_eff * 4) + tn_eff * 4
                 + 6 * proj_bytes + (2 << 20))
    vmem_limit = int(min(56 * 1024 * 1024, footprint + 16 * 1024 * 1024))
    # TODO(synk): for very large D (several K) add a D-reduction axis so the xt/ut
    # blocks stay within v7x's 64 MiB VMEM; untiled D is fine for typical feature dims.

    kernel = functools.partial(_nearest_subspace_kernel, cbi=cbi, kp=kp, cpo=cpo,
                               n_inner=n_inner, unroll=bool(n_inner <= 8))
    out = pl.pallas_call(
        kernel,
        out_shape=jax.ShapeDtypeStruct((1, n_pad), jnp.int32),
        grid_spec=pltpu.PrefetchScalarGridSpec(
            num_scalar_prefetch=0,
            grid=(n_tiles, n_outer),
            in_specs=[
                pl.BlockSpec((D, tn_eff), lambda i, c: (0, i)),        # sample tile
                pl.BlockSpec((cpo * kp, D), lambda i, c: (c, 0)),      # U chunk (resident if n_outer==1)
            ],
            out_specs=pl.BlockSpec((1, tn_eff), lambda i, c: (0, i)),  # lane-dense preds
            scratch_shapes=[pltpu.VMEM((1, tn_eff), jnp.float32)],     # running best energy
        ),
        compiler_params=pltpu.CompilerParams(
            # N-tile axis parallel (both TCs on v7x); class-chunk axis is the reduction.
            dimension_semantics=("parallel", "arbitrary"),
            vmem_limit_bytes=vmem_limit,
        ),
    )(xt, ut)
    return out[0, :N]


def build_u_factors(feat_cov, n_components):
    """One-time parameter glue (matches _get_projections' torch.symeig + topk):
    returns the top-n_components eigenvectors U of each class covariance, (C, D, K)."""
    _, eigvecs = jnp.linalg.eigh(feat_cov)      # ascending eigenvalues
    return eigvecs[:, :, -n_components:]


if __name__ == "__main__":
    # Small deterministic setup consistent with the module.
    num_classes = 4
    feat_dim = 32
    n_components = 5
    num_samples = 16

    key = jax.random.PRNGKey(0)
    k_cov, k_mean, k_feat = jax.random.split(key, 3)

    # Symmetric PSD covariance per class: A A^T.
    A = jax.random.normal(k_cov, (num_classes, feat_dim, feat_dim), dtype=jnp.float32)
    feat_cov = jnp.einsum('cij,ckj->cik', A, A)
    feat_mean = jax.random.normal(k_mean, (feat_dim,), dtype=jnp.float32)
    features = jax.random.normal(k_feat, (num_samples, feat_dim), dtype=jnp.float32)

    u = build_u_factors(feat_cov, n_components)                # (C, D, K)

    # Pure-JAX reference of the ORIGINAL forward (full P = I - U U^T, norm, argmin).
    proj = jnp.eye(feat_dim, dtype=jnp.float32)[None] - jnp.einsum('cdk,cek->cde', u, u)
    xc = features - feat_mean[None, :]
    residual = jnp.einsum('nd,ced->cne', xc, proj)             # xc @ P_c^T
    scores = jnp.linalg.norm(residual, axis=-1)                # (C, N)
    ref_preds = jnp.argmin(scores, axis=0).astype(jnp.int32)   # (N,)

    # f32 path: bit-exact class selection against the f32 reference.
    preds_f32 = fast_nearest_subspace_predict(features, feat_mean, u,
                                              compute_dtype=jnp.float32)
    preds_f32 = jax.block_until_ready(preds_f32)
    assert jnp.array_equal(preds_f32, ref_preds), (preds_f32, ref_preds)

    # Default bf16 path: only allowed to differ where the reference top-2 scores are
    # near-tied (decision-boundary samples).
    preds_bf16 = fast_nearest_subspace_predict(features, feat_mean, u)
    preds_bf16 = jax.block_until_ready(preds_bf16)
    s_sorted = jnp.sort(scores, axis=0)
    rel_gap = (s_sorted[1] - s_sorted[0]) / (s_sorted[0] + 1e-6)
    ok = (preds_bf16 == ref_preds) | (rel_gap < 5e-2)
    assert bool(jnp.all(ok)), (preds_bf16, ref_preds, rel_gap)

    print("KERNEL_OK")
</pallas_src>

<mosaic_0001>
module attributes {stable_mosaic.version = 11 : i64} {
  func.func @_nearest_subspace_kernel(%arg0: i32, %arg1: i32, %arg2: memref<32x128xf32, #tpu.memory_space<vmem>>, %arg3: memref<256x32xf32, #tpu.memory_space<vmem>>, %arg4: memref<1x128xi32, #tpu.memory_space<vmem>>, %arg5: memref<1x128xf32, #tpu.memory_space<vmem>>) attributes {dimension_semantics = [#tpu.dimension_semantics<parallel>, #tpu.dimension_semantics<arbitrary>], iteration_bounds = array<i64: 1, 1>, scalar_prefetch = 0 : i64, scratch_operands = 1 : i64, tpu.core_type = #tpu.core_type<tc>, window_params = [{transform_indices = @transform_0, window_bounds = array<i64: 32, 128>}, {transform_indices = @transform_1, window_bounds = array<i64: 256, 32>}, {transform_indices = @transform_2, window_bounds = array<i64: 1, 128>}]} {
    %c0_i32 = arith.constant 0 : i32
    %0 = arith.cmpi eq, %arg1, %c0_i32 : i32
    %1 = arith.extui %0 : i1 to i32
    %c0_i32_0 = arith.constant 0 : i32
    %2 = arith.cmpi ne, %1, %c0_i32_0 : i32
    scf.if %2 {
      %cst_18 = arith.constant 0xFF800000 : f32
      %34 = vector.broadcast %cst_18 : f32 to vector<1x128xf32>
      %c0_19 = arith.constant 0 : index
      %c0_20 = arith.constant 0 : index
      %35 = vector.load %arg5[%c0_19, %c0_20] : memref<1x128xf32, #tpu.memory_space<vmem>>, vector<1x128xf32>
      tpu.vector_store %arg5[%c0_19, %c0_20], %34 {strides = array<i32>} : memref<1x128xf32, #tpu.memory_space<vmem>>, vector<1x128xf32>,
      %c0_i32_21 = arith.constant 0 : i32
      %36 = vector.broadcast %c0_i32_21 : i32 to vector<1x128xi32>
      %c0_22 = arith.constant 0 : index
      %c0_23 = arith.constant 0 : index
      %37 = vector.load %arg4[%c0_22, %c0_23] : memref<1x128xi32, #tpu.memory_space<vmem>>, vector<1x128xi32>
      tpu.vector_store %arg4[%c0_22, %c0_23], %36 {strides = array<i32>} : memref<1x128xi32, #tpu.memory_space<vmem>>, vector<1x128xi32>,
    } else {
    }
    %c0 = arith.constant 0 : index
    %c0_1 = arith.constant 0 : index
    %3 = vector.load %arg2[%c0, %c0_1] : memref<32x128xf32, #tpu.memory_space<vmem>>, vector<32x128xf32>
    %c32_i32 = arith.constant 32 : i32
    %4 = arith.muli %arg1, %c32_i32 : i32
    %5 = tpu.iota {dimensions = array<i32: 0>} : vector<32x128xi32>
    %c0_i32_2 = arith.constant 0 : i32
    %c256_i32 = arith.constant 256 : i32
    %6 = arith.muli %c0_i32_2, %c256_i32 : i32
    %7 = tpu.assume_multiple %6, 256 : i32
    %8 = arith.index_cast %7 : i32 to index
    %c0_3 = arith.constant 0 : index
    %9 = vector.load %arg3[%8, %c0_3] : memref<256x32xf32, #tpu.memory_space<vmem>>, vector<256x32xf32>
    %cst = arith.constant dense<0.000000e+00> : vector<256x128xf32>
    %10 = tpu.matmul %9, %3, %cst {dimension_numbers = #tpu.dot_dimension_numbers<[1], [0], [0], [1], [0, 0, 1, 1], [], []>} : vector<256x32xf32>, vector<32x128xf32>, vector<256x128xf32> -> vector<256x128xf32>
    %11 = arith.mulf %10, %10 : vector<256x128xf32>
    %12 = vector.shape_cast %11 : vector<256x128xf32> to vector<32x8x128xf32>
    %cst_4 = arith.constant dense<0.000000e+00> : vector<32x128xf32>
    %13 = vector.multi_reduction <add>, %12, %cst_4 [1] : vector<32x8x128xf32> to vector<32x128xf32>
    %c32_i32_5 = arith.constant 32 : i32
    %14 = arith.muli %c0_i32_2, %c32_i32_5 : i32
    %15 = arith.addi %4, %14 : i32
    %16 = vector.broadcast %15 : i32 to vector<32x128xi32>
    %17 = arith.addi %5, %16 : vector<32x128xi32>
    %cst_6 = arith.constant dense<0xFF800000> : vector<128xf32>
    %18 = vector.multi_reduction <maximumf>, %13, %cst_6 [0] : vector<32x128xf32> to vector<128xf32>
    %19 = vector.shape_cast %18 : vector<128xf32> to vector<1x128xf32>
    %20 = vector.broadcast %19 : vector<1x128xf32> to vector<32x128xf32>
    %21 = arith.cmpf oeq, %13, %20 : vector<32x128xf32>
    %c2147483647_i32 = arith.constant 2147483647 : i32
    %22 = vector.broadcast %c2147483647_i32 : i32 to vector<32x128xi32>
    %23 = arith.select %21, %17, %22 : vector<32x128xi1>, vector<32x128xi32>
    %cst_7 = arith.constant dense<2147483647> : vector<128xi32>
    %24 = vector.multi_reduction <minsi>, %23, %cst_7 [0] : vector<32x128xi32> to vector<128xi32>
    %25 = vector.shape_cast %24 : vector<128xi32> to vector<1x128xi32>
    %c0_8 = arith.constant 0 : index
    %c0_9 = arith.constant 0 : index
    %26 = vector.load %arg5[%c0_8, %c0_9] : memref<1x128xf32, #tpu.memory_space<vmem>>, vector<1x128xf32>
    %27 = arith.cmpf ogt, %19, %26 : vector<1x128xf32>
    %c0_10 = arith.constant 0 : index
    %c0_11 = arith.constant 0 : index
    %28 = vector.load %arg5[%c0_10, %c0_11] : memref<1x128xf32, #tpu.memory_space<vmem>>, vector<1x128xf32>
    %29 = arith.select %27, %19, %28 : vector<1x128xi1>, vector<1x128xf32>
    %c0_12 = arith.constant 0 : index
    %c0_13 = arith.constant 0 : index
    %30 = vector.load %arg5[%c0_12, %c0_13] : memref<1x128xf32, #tpu.memory_space<vmem>>, vector<1x128xf32>
    tpu.vector_store %arg5[%c0_12, %c0_13], %29 {strides = array<i32>} : memref<1x128xf32, #tpu.memory_space<vmem>>, vector<1x128xf32>,
    %c0_14 = arith.constant 0 : index
    %c0_15 = arith.constant 0 : index
    %31 = vector.load %arg4[%c0_14, %c0_15] : memref<1x128xi32, #tpu.memory_space<vmem>>, vector<1x128xi32>
    %32 = arith.select %27, %25, %31 : vector<1x128xi1>, vector<1x128xi32>
    %c0_16 = arith.constant 0 : index
    %c0_17 = arith.constant 0 : index
    %33 = vector.load %arg4[%c0_16, %c0_17] : memref<1x128xi32, #tpu.memory_space<vmem>>, vector<1x128xi32>
    tpu.vector_store %arg4[%c0_16, %c0_17], %32 {strides = array<i32>} : memref<1x128xi32, #tpu.memory_space<vmem>>, vector<1x128xi32>,
    %c1_i32 = arith.constant 1 : i32
    return
  }
  func.func @transform_0(%arg0: i32, %arg1: i32) -> (i32, i32) {
    %c0_i32 = arith.constant 0 : i32
    %c0_i32_0 = arith.constant 0 : i32
    return %c0_i32, %arg0 : i32, i32
  }
  func.func @transform_1(%arg0: i32, %arg1: i32) -> (i32, i32) {
    %c0_i32 = arith.constant 0 : i32
    %c0_i32_0 = arith.constant 0 : i32
    return %arg1, %c0_i32 : i32, i32
  }
  func.func @transform_2(%arg0: i32, %arg1: i32) -> (i32, i32) {
    %c0_i32 = arith.constant 0 : i32
    %c0_i32_0 = arith.constant 0 : i32
    return %c0_i32, %arg0 : i32, i32
  }
}

</mosaic_0001>

<bundles_post_ra>
// kernel: tpu_custom_call.1
= control target key start
LH: loop header
LB: loop body
LE: loop exit
PB: predicated region body
PF: predicated region fallthrough
CT: control target
= control target key end

     0   :  { %vm60_vm0 = vcmask 261120   ;;  %s1531_s0 = inlined_call_operand.vmem [shape: f32[32,128], index: 0, kind: input, shape index: {}]   ;;  %s1532_s1 = inlined_call_operand.vmem [shape: f32[256,32], index: 1, kind: input, shape index: {}]   ;;  %s1533_s2 = inlined_call_operand.hbm [shape: s32[1,128], index: 2, kind: output, shape index: {}]  }
   0x1   :  { %v21_v0 = vld [vmem:[%s1531_s0 + $0x18] sm:$0xff]  ;;  %v20_v1 = vld [vmem:[%s1531_s0 + $0x10] sm:$0xff]  ;;  %v19_v2 = vld [vmem:[%s1531_s0 + $0x8] sm:$0xff] }
   0x2   :  { %918 = vmatprep.subr.mxu0 %v21_v0  ;;  %974 = vmatprep.subr.mxu1 %v21_v0  ;;  %v18_v3 = vld [vmem:[%s1531_s0] sm:$0xff]  ;;  %v29_v6 = vld [vmem:[%s1532_s1 + $0x8] sm:$0xff]  ;;  %v30_v8 = vld [vmem:[%s1532_s1 + $0x10] sm:$0xff] }
   0x3   :  { %919 = vmatpush3.msra.mxu0 %v21_v0  ;;  %978 = vmatpush3.msra.mxu1 %v21_v0  ;;  %v28_v4 = vld [vmem:[%s1532_s1] sm:$0xff]  ;;  %v45_v7 = vld [vmem:[%s1532_s1 + $0x88] sm:$0xff]  ;;  %v46_v9 = vld [vmem:[%s1532_s1 + $0x90] sm:$0xff] }
   0x4   :  { %920 = vmatprep.subr.mxu0 %v20_v1  ;;  %975 = vmatprep.subr.mxu1 %v20_v1  ;;  %v44_v5 = vld [vmem:[%s1532_s1 + $0x80] sm:$0xff]  ;;  %v31_v10 = vld [vmem:[%s1532_s1 + $0x18] sm:$0xff] }
   0x5   :  { %921 = vmatpush3.msra.mxu0 %v20_v1  ;;  %979 = vmatpush3.msra.mxu1 %v20_v1  ;;  %v47_v11 = vld [vmem:[%s1532_s1 + $0x98] sm:$0xff]  ;;  %v32_v12 = vld [vmem:[%s1532_s1 + $0x20] sm:$0xff] }
   0x6   :  { %922 = vmatprep.subr.mxu0 %v19_v2  ;;  %976 = vmatprep.subr.mxu1 %v19_v2  ;;  %v48_v13 = vld [vmem:[%s1532_s1 + $0xa0] sm:$0xff] }
   0x7   :  { %923 = vmatpush3.msra.mxu0 %v19_v2  ;;  %980 = vmatpush3.msra.mxu1 %v19_v2 }
   0x8   :  { %924 = vmatprep.subr.mxu0 %v18_v3  ;;  %977 = vmatprep.subr.mxu1 %v18_v3 }
   0x9   :  { %925 = vmatpush3.msra.mxu0 %v18_v3  ;;  %981 = vmatpush3.msra.mxu1 %v18_v3 }
   0xa   :  { %926 = vmatprep.mubr.msk.f32.mxu0 %vm60_vm0, %v28_v4  ;;  %950 = vmatprep.mubr.msk.f32.mxu1 %vm60_vm0, %v44_v5 }
   0xb   :  { %927 = vmatmul.mubr.msk.f32.vlgmr.msra.gmra.mxu0 %vm60_vm0, %v29_v6  ;;  %951 = vmatmul.mubr.msk.f32.vlgmr.msra.gmra.mxu1 %vm60_vm0, %v45_v7 }
   0xc   :  { %929 = vmatprep.mubr.msk.f32.mxu0 %vm60_vm0, %v30_v8  ;;  %953 = vmatprep.mubr.msk.f32.mxu1 %vm60_vm0, %v46_v9 }
   0xd   :  { %7 = vsyncpa [#allocation4], 0  ;;  %v33_v14 = vld [vmem:[%s1532_s1 + $0x28] sm:$0xff]  ;;  %v34_v16 = vld [vmem:[%s1532_s1 + $0x30] sm:$0xff]  ;;  %v1007_v36 = vmov -inf   ;;  %v1008_v37 = vmov 0   ;;  %v23_v42 = vlaneseq }
   0xe   :  { %v49_v15 = vld [vmem:[%s1532_s1 + $0xa8] sm:$0xff]  ;;  %v50_v17 = vld [vmem:[%s1532_s1 + $0xb0] sm:$0xff]  ;;  %v35_v18 = vld [vmem:[%s1532_s1 + $0x38] sm:$0xff]  ;;  %16 = vst [vmem:[#allocation2] sm:$0x1] %v1007_v36  ;;  %vm1534_vm1 = vcmask 1040384  }
   0xf   :  { %930 = vmatmul.mubr.msk.f32.gmra.mxu0 %vm60_vm0, %v31_v10  ;;  %954 = vmatmul.mubr.msk.f32.gmra.mxu1 %vm60_vm0, %v47_v11  ;;  %v51_v19 = vld [vmem:[%s1532_s1 + $0xb8] sm:$0xff]  ;;  %v36_v20 = vld [vmem:[%s1532_s1 + $0x40] sm:$0xff]  ;;  %v37_v22 = vld [vmem:[%s1532_s1 + $0x48] sm:$0xff]  ;;  %17 = vst [vmem:[#allocation3] sm:$0x1] %v1008_v37  ;;  %v1165_v55 = vshrl.u32 %v23_v42, 7 }
  0x10   :  { %932 = vmatprep.mubr.msk.f32.mxu0 %vm60_vm0, %v32_v12  ;;  %956 = vmatprep.mubr.msk.f32.mxu1 %vm60_vm0, %v48_v13  ;;  %v52_v21 = vld [vmem:[%s1532_s1 + $0xc0] sm:$0xff]  ;;  %v53_v23 = vld [vmem:[%s1532_s1 + $0xc8] sm:$0xff]  ;;  %v38_v24 = vld [vmem:[%s1532_s1 + $0x50] sm:$0xff] }
  0x11   :  { %v54_v25 = vld [vmem:[%s1532_s1 + $0xd0] sm:$0xff]  ;;  %v39_v26 = vld [vmem:[%s1532_s1 + $0x58] sm:$0xff]  ;;  %v40_v28 = vld [vmem:[%s1532_s1 + $0x60] sm:$0xff] }
  0x12   :  { %v55_v27 = vld [vmem:[%s1532_s1 + $0xd8] sm:$0xff]  ;;  %v56_v29 = vld [vmem:[%s1532_s1 + $0xe0] sm:$0xff]  ;;  %v41_v30 = vld [vmem:[%s1532_s1 + $0x68] sm:$0xff] }
  0x13   :  { %933 = vmatmul.mubr.msk.f32.gmra.mxu0 %vm60_vm0, %v33_v14  ;;  %957 = vmatmul.mubr.msk.f32.gmra.mxu1 %vm60_vm0, %v49_v15  ;;  %v57_v31 = vld [vmem:[%s1532_s1 + $0xe8] sm:$0xff]  ;;  %v42_v32 = vld [vmem:[%s1532_s1 + $0x70] sm:$0xff]  ;;  %v43_v34 = vld [vmem:[%s1532_s1 + $0x78] sm:$0xff] }
  0x14   :  { %935 = vmatprep.mubr.msk.f32.mxu0 %vm60_vm0, %v34_v16  ;;  %959 = vmatprep.mubr.msk.f32.mxu1 %vm60_vm0, %v50_v17  ;;  %v58_v33 = vld [vmem:[%s1532_s1 + $0xf0] sm:$0xff]  ;;  %v59_v35 = vld [vmem:[%s1532_s1 + $0xf8] sm:$0xff]  ;;  %s1009_s1 = smov [#allocation3]  }
  0x15   :  { %s842_s0 = sshll.u32 %s1009_s1, 4  ;;  %s843_s0 = int_to_ptr.vmem [resolvable:$true] %s842_s0 }
  0x16   :  { %s985_s23 = scalar_lea.vmem %s843_s0, 16  ;;  %s989_s24 = scalar_lea.vmem %s843_s0, 32 }
  0x17   :  { %936 = vmatmul.mubr.msk.f32.gmra.mxu0 %vm60_vm0, %v35_v18  ;;  %960 = vmatmul.mubr.msk.f32.gmra.mxu1 %vm60_vm0, %v51_v19  ;;  %p986_p0 = scmp.ne.s32.totalorder %s843_s0, %s985_s23  ;;  %p990_p1 = scmp.lt.s32.totalorder %s843_s0, %s843_s0 }
  0x18   :  { %938 = vmatprep.mubr.msk.f32.mxu0 %vm60_vm0, %v36_v20  ;;  %962 = vmatprep.mubr.msk.f32.mxu1 %vm60_vm0, %v52_v21  ;;  %p991_p2 = scmp.lt.s32.totalorder %s989_s24, %s985_s23 }
  0x1a   :  { %p992_p3 = por %p991_p2, %p990_p1 }
  0x1b   :  { %939 = vmatmul.mubr.msk.f32.gmra.mxu0 %vm60_vm0, %v37_v22  ;;  %963 = vmatmul.mubr.msk.f32.gmra.mxu1 %vm60_vm0, %v53_v23 }
  0x1c   :  { %941 = vmatprep.mubr.msk.f32.mxu0 %vm60_vm0, %v38_v24  ;;  %965 = vmatprep.mubr.msk.f32.mxu1 %vm60_vm0, %v54_v25  ;;  %p993_p4 = pnand %p992_p3, %p986_p0 }
  0x1f   :  { %942 = vmatmul.mubr.msk.f32.gmra.mxu0 %vm60_vm0, %v39_v26  ;;  %966 = vmatmul.mubr.msk.f32.gmra.mxu1 %vm60_vm0, %v55_v27 }
  0x20   :  { %944 = vmatprep.mubr.msk.f32.mxu0 %vm60_vm0, %v40_v28  ;;  %968 = vmatprep.mubr.msk.f32.mxu1 %vm60_vm0, %v56_v29 }
  0x23   :  { %945 = vmatmul.mubr.msk.f32.gmra.mxu0 %vm60_vm0, %v41_v30  ;;  %969 = vmatmul.mubr.msk.f32.gmra.mxu1 %vm60_vm0, %v57_v31 }
  0x24   :  { %947 = vmatprep.mubr.msk.f32.mxu0 %vm60_vm0, %v42_v32  ;;  %971 = vmatprep.mubr.msk.f32.mxu1 %vm60_vm0, %v58_v33 }
  0x27   :  { %948 = vmatmul.mubr.msk.f32.gmra.mxu0 %vm60_vm0, %v43_v34  ;;  %972 = vmatmul.mubr.msk.f32.gmra.mxu1 %vm60_vm0, %v59_v35 }
  0xcb   :  { %v928_v38 = vpop.f32.mrf.mxu0  ;;  %v952_v39 = vpop.f32.mrf.mxu1 }
  0xcc   :  { %v383_v40 = vmul.f32 %v928_v38, %v928_v38  ;;  %v399_v41 = vmul.f32 %v952_v39, %v952_v39 }
  0xcd   :  { %v223_v43 = vpop.f32.mrf.mxu0  ;;  %v303_v44 = vpop.f32.mrf.mxu1 }
  0xce   :  { %v420_v45 = vrot.slane %v383_v40, 4  ;;  %v516_v46 = vrot.slane %v399_v41, 4  ;;  %v382_v47 = vmul.f32 %v223_v43, %v223_v43  ;;  %v398_v48 = vmul.f32 %v303_v44, %v303_v44 }
  0xcf   :  { %v931_v49 = vpop.f32.mrf.mxu0  ;;  %v955_v50 = vpop.f32.mrf.mxu1 }
  0xd0   :  { %v421_v51 = vadd.f32 %v420_v45, %v383_v40  ;;  %v517_v52 = vadd.f32 %v516_v46, %v399_v41  ;;  %v414_v53 = vrot.slane %v382_v47, 4  ;;  %v510_v54 = vrot.slane %v398_v48, 4 }
  0xd1   :  { %v385_v56 = vmul.f32 %v931_v49, %v931_v49  ;;  %v401_v57 = vmul.f32 %v955_v50, %v955_v50  ;;  %v233_v58 = vpop.f32.mrf.mxu0  ;;  %v313_v59 = vpop.f32.mrf.mxu1 }
  0xd2   :  { %v422_v60 = vrot.slane %v421_v51, 2  ;;  %v518_v61 = vrot.slane %v517_v52, 2  ;;  %v415_v62 = vadd.f32 %v414_v53, %v382_v47  ;;  %v511_v63 = vadd.f32 %v510_v54, %v398_v48 }
  0xd3   :  { %v432_v0 = vrot.slane %v385_v56, 4  ;;  %v528_v1 = vrot.slane %v401_v57, 4  ;;  %v384_v2 = vmul.f32 %v233_v58, %v233_v58  ;;  %v400_v3 = vmul.f32 %v313_v59, %v313_v59  ;;  %v934_v8 = vpop.f32.mrf.mxu0  ;;  %v958_v25 = vpop.f32.mrf.mxu1 }
  0xd4   :  { %v423_v4 = vadd.f32 %v422_v60, %v421_v51  ;;  %v519_v5 = vadd.f32 %v518_v61, %v517_v52  ;;  %v416_v6 = vrot.slane %v415_v62, 2  ;;  %v512_v7 = vrot.slane %v511_v63, 2 }
  0xd5   :  { %v433_v9 = vadd.f32 %v432_v0, %v385_v56  ;;  %v529_v10 = vadd.f32 %v528_v1, %v401_v57  ;;  %v426_v11 = vrot.slane %v384_v2, 4  ;;  %v522_v12 = vrot.slane %v400_v3, 4  ;;  %v243_v26 = vpop.f32.mrf.mxu0  ;;  %v323_v44 = vpop.f32.mrf.mxu1 }
  0xd6   :  { %v424_v13 = vrot.slane %v423_v4, 1  ;;  %v520_v14 = vrot.slane %v519_v5, 1  ;;  %v417_v15 = vadd.f32 %v416_v6, %v415_v62  ;;  %v513_v16 = vadd.f32 %v512_v7, %v511_v63 }
  0xd7   :  { %v434_v17 = vrot.slane %v433_v9, 2  ;;  %v530_v18 = vrot.slane %v529_v10, 2  ;;  %v427_v19 = vadd.f32 %v426_v11, %v384_v2  ;;  %v523_v20 = vadd.f32 %v522_v12, %v400_v3  ;;  %v937_v35 = vpop.f32.mrf.mxu0  ;;  %v961_v63 = vpop.f32.mrf.mxu1 }
  0xd8   :  { %v1167_v21 = vadd.f32 %v424_v13, %v423_v4  ;;  %v1169_v22 = vadd.f32 %v520_v14, %v519_v5  ;;  %v418_v23 = vrot.slane %v417_v15, 1  ;;  %v514_v24 = vrot.slane %v513_v16, 1 }
  0xd9   :  { %v435_v27 = vadd.f32 %v434_v17, %v433_v9  ;;  %v531_v28 = vadd.f32 %v530_v18, %v529_v10  ;;  %v428_v29 = vrot.slane %v427_v19, 2  ;;  %v524_v30 = vrot.slane %v523_v20, 2  ;;  %v253_v53 = vpop.f32.mrf.mxu0 }
  0xda   :  { %v612_v31 = vmax.f32 %v1167_v21, %v1169_v22  ;;  %v1173_v32 = vadd.f32 %v418_v23, %v417_v15  ;;  %v1175_v33 = vadd.f32 %v514_v24, %v513_v16  ;;  %v387_v34 = vmul.f32 %v934_v8, %v934_v8  ;;  %v333_v16 = vpop.f32.mrf.mxu1 }
  0xdb   :  { %v436_v36 = vrot.slane %v435_v27, 1  ;;  %v532_v37 = vrot.slane %v531_v28, 1  ;;  %v429_v38 = vadd.f32 %v428_v29, %v427_v19  ;;  %v525_v39 = vadd.f32 %v524_v30, %v523_v20 }
  0xdc   :  { %v611_v40 = vmax.f32 %v1173_v32, %v612_v31  ;;  %v444_v41 = vrot.slane %v387_v34, 4  ;;  %v403_v42 = vmul.f32 %v958_v25, %v958_v25  ;;  %v386_v43 = vmul.f32 %v243_v26, %v243_v26 }
  0xdd   :  { %v1178_v45 = vadd.f32 %v436_v36, %v435_v27  ;;  %v1180_v46 = vadd.f32 %v532_v37, %v531_v28  ;;  %v430_v47 = vrot.slane %v429_v38, 1  ;;  %v526_v48 = vrot.slane %v525_v39, 1  ;;  %v940_v27 = vpop.f32.mrf.mxu0  ;;  %v964_v28 = vpop.f32.mrf.mxu1 }
  0xde   :  { %v614_v49 = vmax.f32 %v1175_v33, %v611_v40  ;;  %v445_v50 = vadd.f32 %v444_v41, %v387_v34  ;;  %v540_v51 = vrot.slane %v403_v42, 4  ;;  %v438_v52 = vrot.slane %v386_v43, 4 }
  0xdf   :  { %v1183_v54 = vadd.f32 %v430_v47, %v429_v38  ;;  %v1185_v56 = vadd.f32 %v526_v48, %v525_v39  ;;  %v402_v57 = vmul.f32 %v323_v44, %v323_v44  ;;  %v389_v58 = vmul.f32 %v937_v35, %v937_v35 }
  0xe0   :  { %v613_v59 = vmax.f32 %v1178_v45, %v614_v49  ;;  %v446_v60 = vrot.slane %v445_v50, 2  ;;  %v541_v61 = vadd.f32 %v540_v51, %v403_v42  ;;  %v439_v62 = vadd.f32 %v438_v52, %v386_v43  ;;  %v263_v49 = vpop.f32.mrf.mxu0 }
  0xe1   :  { %v534_v0 = vrot.slane %v402_v57, 4  ;;  %v456_v1 = vrot.slane %v389_v58, 4  ;;  %v405_v2 = vmul.f32 %v961_v63, %v961_v63  ;;  %v388_v3 = vmul.f32 %v253_v53, %v253_v53 }
  0xe2   :  { %v616_v4 = vmax.f32 %v1180_v46, %v613_v59  ;;  %v447_v5 = vadd.f32 %v446_v60, %v445_v50  ;;  %v542_v6 = vrot.slane %v541_v61, 2  ;;  %v440_v7 = vrot.slane %v439_v62, 2  ;;  %v343_v50 = vpop.f32.mrf.mxu1 }
  0xe3   :  { %v535_v8 = vadd.f32 %v534_v0, %v402_v57  ;;  %v457_v9 = vadd.f32 %v456_v1, %v389_v58  ;;  %v552_v10 = vrot.slane %v405_v2, 4  ;;  %v450_v11 = vrot.slane %v388_v3, 4 }
  0xe4   :  { %v615_v12 = vmax.f32 %v1183_v54, %v616_v4  ;;  %v448_v13 = vrot.slane %v447_v5, 1  ;;  %v543_v14 = vadd.f32 %v542_v6, %v541_v61  ;;  %v441_v15 = vadd.f32 %v440_v7, %v439_v62  ;;  %v943_v6 = vpop.f32.mrf.mxu0  ;;  %v967_v7 = vpop.f32.mrf.mxu1 }
  0xe5   :  { %v536_v17 = vrot.slane %v535_v8, 2  ;;  %v458_v18 = vrot.slane %v457_v9, 2  ;;  %v553_v19 = vadd.f32 %v552_v10, %v405_v2  ;;  %v451_v20 = vadd.f32 %v450_v11, %v388_v3 }
  0xe6   :  { %v618_v23 = vmax.f32 %v1185_v56, %v615_v12  ;;  %v1191_v24 = vadd.f32 %v448_v13, %v447_v5  ;;  %v544_v25 = vrot.slane %v543_v14, 1  ;;  %v442_v26 = vrot.slane %v441_v15, 1 }
  0xe7   :  { %v537_v29 = vadd.f32 %v536_v17, %v535_v8  ;;  %v459_v30 = vadd.f32 %v458_v18, %v457_v9  ;;  %v554_v31 = vrot.slane %v553_v19, 2  ;;  %v452_v34 = vrot.slane %v451_v20, 2 }
  0xe8   :  { %v617_v35 = vmax.f32 %v1191_v24, %v618_v23  ;;  %v1194_v36 = vadd.f32 %v544_v25, %v543_v14  ;;  %v1196_v37 = vadd.f32 %v442_v26, %v441_v15  ;;  %v404_v38 = vmul.f32 %v333_v16, %v333_v16 }
  0xe9   :  { %v538_v39 = vrot.slane %v537_v29, 1  ;;  %v460_v40 = vrot.slane %v459_v30, 1  ;;  %v555_v41 = vadd.f32 %v554_v31, %v553_v19  ;;  %v453_v42 = vadd.f32 %v452_v34, %v451_v20 }
  0xea   :  { %v620_v43 = vmax.f32 %v1194_v36, %v617_v35  ;;  %v546_v44 = vrot.slane %v404_v38, 4  ;;  %v391_v47 = vmul.f32 %v940_v27, %v940_v27  ;;  %v407_v48 = vmul.f32 %v964_v28, %v964_v28  ;;  %v273_v27 = vpop.f32.mrf.mxu0 }
  0xeb   :  { %v1199_v51 = vadd.f32 %v538_v39, %v537_v29  ;;  %v1201_v52 = vadd.f32 %v460_v40, %v459_v30  ;;  %v556_v53 = vrot.slane %v555_v41, 1  ;;  %v454_v57 = vrot.slane %v453_v42, 1  ;;  %v353_v40 = vpop.f32.mrf.mxu1 }
  0xec   :  { %v624_v58 = vmax.f32 %v620_v43, %v1196_v37  ;;  %v547_v59 = vadd.f32 %v546_v44, %v404_v38  ;;  %v468_v60 = vrot.slane %v391_v47, 4  ;;  %v564_v61 = vrot.slane %v407_v48, 4 }
  0xed   :  { %v1204_v62 = vadd.f32 %v556_v53, %v555_v41  ;;  %v1206_v63 = vadd.f32 %v454_v57, %v453_v42  ;;  %v390_v0 = vmul.f32 %v263_v49, %v263_v49  ;;  %v406_v1 = vmul.f32 %v343_v50, %v343_v50  ;;  %v946_v41 = vpop.f32.mrf.mxu0  ;;  %v970_v57 = vpop.f32.mrf.mxu1 }
  0xee   :  { %v628_v2 = vmax.f32 %v624_v58, %v1199_v51  ;;  %v548_v3 = vrot.slane %v547_v59, 2  ;;  %v469_v4 = vadd.f32 %v468_v60, %v391_v47  ;;  %v565_v5 = vadd.f32 %v564_v61, %v407_v48 }
  0xef   :  { %v462_v8 = vrot.slane %v390_v0, 4  ;;  %v558_v9 = vrot.slane %v406_v1, 4  ;;  %v393_v10 = vmul.f32 %v943_v6, %v943_v6  ;;  %v409_v11 = vmul.f32 %v967_v7, %v967_v7 }
  0xf0   :  { %v632_v12 = vmax.f32 %v628_v2, %v1201_v52  ;;  %v549_v13 = vadd.f32 %v548_v3, %v547_v59  ;;  %v470_v14 = vrot.slane %v469_v4, 2  ;;  %v566_v15 = vrot.slane %v565_v5, 2 }
  0xf1   :  { %v463_v16 = vadd.f32 %v462_v8, %v390_v0  ;;  %v559_v17 = vadd.f32 %v558_v9, %v406_v1  ;;  %v480_v18 = vrot.slane %v393_v10, 4  ;;  %v576_v19 = vrot.slane %v409_v11, 4 }
  0xf2   :  { %v636_v20 = vmax.f32 %v632_v12, %v1204_v62  ;;  %v550_v23 = vrot.slane %v549_v13, 1  ;;  %v471_v25 = vadd.f32 %v470_v14, %v469_v4  ;;  %v567_v26 = vadd.f32 %v566_v15, %v565_v5  ;;  %v283_v4 = vpop.f32.mrf.mxu0 }
  0xf3   :  { %v464_v28 = vrot.slane %v463_v16, 2  ;;  %v560_v29 = vrot.slane %v559_v17, 2  ;;  %v481_v30 = vadd.f32 %v480_v18, %v393_v10  ;;  %v577_v31 = vadd.f32 %v576_v19, %v409_v11 }
  0xf4   :  { %v619_v34 = vmax.f32 %v1206_v63, %v636_v20  ;;  %v1212_v35 = vadd.f32 %v550_v23, %v549_v13  ;;  %v472_v38 = vrot.slane %v471_v25, 1  ;;  %v568_v39 = vrot.slane %v567_v26, 1  ;;  %v363_v13 = vpop.f32.mrf.mxu1 }
  0xf5   :  { %v465_v42 = vadd.f32 %v464_v28, %v463_v16  ;;  %v561_v43 = vadd.f32 %v560_v29, %v559_v17  ;;  %v482_v44 = vrot.slane %v481_v30, 2  ;;  %v578_v47 = vrot.slane %v577_v31, 2 }
  0xf6   :  { %v623_v48 = vmax.f32 %v619_v34, %v1212_v35  ;;  %v1215_v49 = vadd.f32 %v472_v38, %v471_v25  ;;  %v1217_v50 = vadd.f32 %v568_v39, %v567_v26  ;;  %v392_v53 = vmul.f32 %v273_v27, %v273_v27  ;;  %v949_v25 = vpop.f32.mrf.mxu0 }
  0xf7   :  { %v466_v58 = vrot.slane %v465_v42, 1  ;;  %v562_v59 = vrot.slane %v561_v43, 1  ;;  %v483_v60 = vadd.f32 %v482_v44, %v481_v30  ;;  %v579_v61 = vadd.f32 %v578_v47, %v577_v31 }
  0xf8   :  { %v627_v0 = vmax.f32 %v623_v48, %v1215_v49  ;;  %v474_v1 = vrot.slane %v392_v53, 4  ;;  %v408_v2 = vmul.f32 %v353_v40, %v353_v40  ;;  %v395_v3 = vmul.f32 %v946_v41, %v946_v41 }
  0xf9   :  { %v1220_v5 = vadd.f32 %v466_v58, %v465_v42  ;;  %v1222_v6 = vadd.f32 %v562_v59, %v561_v43  ;;  %v484_v7 = vrot.slane %v483_v60, 1  ;;  %v580_v8 = vrot.slane %v579_v61, 1  ;;  %v973_v43 = vpop.f32.mrf.mxu1 }
  0xfa   :  { %v631_v9 = vmax.f32 %v627_v0, %v1217_v50  ;;  %v475_v10 = vadd.f32 %v474_v1, %v392_v53  ;;  %v570_v11 = vrot.slane %v408_v2, 4  ;;  %v492_v12 = vrot.slane %v395_v3, 4 }
  0xfb   :  { %v1225_v14 = vadd.f32 %v484_v7, %v483_v60  ;;  %v1227_v15 = vadd.f32 %v580_v8, %v579_v61  ;;  %v411_v16 = vmul.f32 %v970_v57, %v970_v57  ;;  %v394_v17 = vmul.f32 %v283_v4, %v283_v4 }
  0xfc   :  { %v635_v18 = vmax.f32 %v631_v9, %v1220_v5  ;;  %v476_v19 = vrot.slane %v475_v10, 2  ;;  %v571_v20 = vadd.f32 %v570_v11, %v408_v2  ;;  %v493_v23 = vadd.f32 %v492_v12, %v395_v3  ;;  %v293_v9 = vpop.f32.mrf.mxu0 }
  0xfd   :  { %v588_v26 = vrot.slane %v411_v16, 4  ;;  %v486_v27 = vrot.slane %v394_v17, 4  ;;  %v410_v28 = vmul.f32 %v363_v13, %v363_v13  ;;  %v397_v29 = vmul.f32 %v949_v25, %v949_v25 }
  0xfe   :  { %v639_v30 = vmax.f32 %v635_v18, %v1222_v6  ;;  %v477_v31 = vadd.f32 %v476_v19, %v475_v10  ;;  %v572_v34 = vrot.slane %v571_v20, 2  ;;  %v494_v38 = vrot.slane %v493_v23, 2  ;;  %v373_v10 = vpop.f32.mrf.mxu1 }
  0xff   :  { %v589_v39 = vadd.f32 %v588_v26, %v411_v16  ;;  %v487_v40 = vadd.f32 %v486_v27, %v394_v17  ;;  %v582_v41 = vrot.slane %v410_v28, 4  ;;  %v504_v42 = vrot.slane %v397_v29, 4 }
 0x100   :  { %v622_v44 = vmax.f32 %v1225_v14, %v639_v30  ;;  %v478_v47 = vrot.slane %v477_v31, 1  ;;  %v573_v48 = vadd.f32 %v572_v34, %v571_v20  ;;  %v495_v53 = vadd.f32 %v494_v38, %v493_v23 }
 0x101   :  { %v590_v57 = vrot.slane %v589_v39, 2  ;;  %v488_v58 = vrot.slane %v487_v40, 2  ;;  %v583_v59 = vadd.f32 %v582_v41, %v410_v28  ;;  %v505_v60 = vadd.f32 %v504_v42, %v397_v29 }
 0x102   :  { %v626_v61 = vmax.f32 %v622_v44, %v1227_v15  ;;  %v1233_v0 = vadd.f32 %v478_v47, %v477_v31  ;;  %v574_v1 = vrot.slane %v573_v48, 1  ;;  %v496_v2 = vrot.slane %v495_v53, 1 }
 0x103   :  { %v591_v3 = vadd.f32 %v590_v57, %v589_v39  ;;  %v489_v4 = vadd.f32 %v488_v58, %v487_v40  ;;  %v584_v7 = vrot.slane %v583_v59, 2  ;;  %v506_v8 = vrot.slane %v505_v60, 2 }
 0x104   :  { %v630_v11 = vmax.f32 %v626_v61, %v1233_v0  ;;  %v1236_v12 = vadd.f32 %v574_v1, %v573_v48  ;;  %v1238_v13 = vadd.f32 %v496_v2, %v495_v53  ;;  %v413_v16 = vmul.f32 %v973_v43, %v973_v43 }
 0x105   :  { %v592_v17 = vrot.slane %v591_v3, 1  ;;  %v490_v18 = vrot.slane %v489_v4, 1  ;;  %v585_v19 = vadd.f32 %v584_v7, %v583_v59  ;;  %v507_v20 = vadd.f32 %v506_v8, %v505_v60 }
 0x106   :  { %v634_v23 = vmax.f32 %v630_v11, %v1236_v12  ;;  %v600_v25 = vrot.slane %v413_v16, 4  ;;  %v396_v26 = vmul.f32 %v293_v9, %v293_v9  ;;  %v412_v27 = vmul.f32 %v373_v10, %v373_v10 }
 0x107   :  { %v1241_v28 = vadd.f32 %v592_v17, %v591_v3  ;;  %v586_v29 = vrot.slane %v585_v19, 1  ;;  %v1245_v39 = vadd.s32 16, %v1165_v55  ;;  %v1247_v40 = vadd.f32 %v490_v18, %v489_v4 }
 0x108   :  { %v638_v30 = vmax.f32 %v634_v23, %v1238_v13  ;;  %v601_v31 = vadd.f32 %v600_v25, %v413_v16  ;;  %v498_v34 = vrot.slane %v396_v26, 4  ;;  %v594_v38 = vrot.slane %v412_v27, 4 }
 0x109   :  { %v508_v41 = vrot.slane %v507_v20, 1  ;;  %v1250_v48 = vadd.f32 %v586_v29, %v585_v19  ;;  %v674_v60 = vrot.slane %v1165_v55, 1  ;;  %v688_v61 = vrot.slane %v1245_v39, 1 }
 0x10a   :  { %v621_v42 = vmax.f32 %v1241_v28, %v638_v30  ;;  %v602_v43 = vrot.slane %v601_v31, 2  ;;  %v499_v44 = vadd.f32 %v498_v34, %v396_v26  ;;  %v595_v47 = vadd.f32 %v594_v38, %v412_v27 }
 0x10b   :  { %v676_v1 = vrot.slane %v1165_v55, 3  ;;  %v1256_v2 = vadd.f32 %v508_v41, %v507_v20  ;;  %v690_v9 = vrot.slane %v1245_v39, 3  ;;  %v675_v10 = vrot.slane %v1165_v55, 2 }
 0x10c   :  { %v625_v53 = vmax.f32 %v621_v42, %v1247_v40  ;;  %v603_v57 = vadd.f32 %v602_v43, %v601_v31  ;;  %v500_v58 = vrot.slane %v499_v44, 2  ;;  %v596_v59 = vrot.slane %v595_v47, 2 }
 0x10d   :  { %v1262_v11 = vadd.s32 8, %v1165_v55  ;;  %v1265_v16 = vadd.s32 24, %v1165_v55  ;;  %v689_v23 = vrot.slane %v1245_v39, 2  ;;  %v678_v25 = vrot.slane %v1165_v55, 5 }
 0x10e   :  { %v629_v3 = vmax.f32 %v625_v53, %v1250_v48  ;;  %v604_v4 = vrot.slane %v603_v57, 1  ;;  %v501_v7 = vadd.f32 %v500_v58, %v499_v44  ;;  %v597_v8 = vadd.f32 %v596_v59, %v595_v47 }
 0x10f   :  { %v692_v26 = vrot.slane %v1245_v39, 5  ;;  %v677_v27 = vrot.slane %v1165_v55, 4  ;;  %v691_v29 = vrot.slane %v1245_v39, 4  ;;  %v680_v30 = vrot.slane %v1165_v55, 7 }
 0x110   :  { %v633_v17 = vmax.f32 %v629_v3, %v1256_v2  ;;  %v1268_v18 = vadd.f32 %v604_v4, %v603_v57  ;;  %v502_v19 = vrot.slane %v501_v7, 1  ;;  %v598_v20 = vrot.slane %v597_v8, 1 }
 0x111   :  { %v679_v41 = vrot.slane %v1165_v55, 6  ;;  %v693_v42 = vrot.slane %v1245_v39, 6  ;;  %v681_v43 = vrot.slane %v1262_v11, 1  ;;  %v683_v47 = vrot.slane %v1262_v11, 3 }
 0x112   :  { %v637_v31 = vmax.f32 %v633_v17, %v1268_v18  ;;  %v503_v34 = vadd.f32 %v502_v19, %v501_v7  ;;  %v599_v57 = vadd.f32 %v598_v20, %v597_v8  ;;  %v697_v58 = vrot.slane %v1265_v16, 3 }
 0x113   :  { %v682_v59 = vrot.slane %v1262_v11, 2  ;;  %v696_v3 = vrot.slane %v1265_v16, 2  ;;  %v685_v4 = vrot.slane %v1262_v11, 5  ;;  %v684_v17 = vrot.slane %v1262_v11, 4 }
 0x114   :  { %v640_v53 = vmax.f32 %v637_v31, %v503_v34  ;;  %v687_v44 = vrot.slane %v1262_v11, 7  ;;  %v686_v20 = vrot.slane %v1262_v11, 6  ;;  %v700_v31 = vrot.slane %v1265_v16, 6 }
 0x116   :  { %v1290_v38 = vmax.f32 %v599_v57, %v640_v53 }
 0x118   :  { %vm644_vm2 = vcmp.eq.f32.partialorder %v1183_v54, %v1290_v38  ;;  %vm648_vm3 = vcmp.eq.f32.partialorder %v1206_v63, %v1290_v38  ;;  %vm652_vm4 = vcmp.eq.f32.partialorder %v1233_v0, %v1290_v38  ;;  %vm656_vm5 = vcmp.eq.f32.partialorder %v503_v34, %v1290_v38 }
 0x119   :  { %vm660_vm6 = vcmp.eq.f32.partialorder %v1185_v56, %v1290_v38  ;;  %vm664_vm7 = vcmp.eq.f32.partialorder %v1212_v35, %v1290_v38  ;;  %vm668_vm8 = vcmp.eq.f32.partialorder %v1236_v12, %v1290_v38  ;;  %vm672_vm9 = vcmp.eq.f32.partialorder %v599_v57, %v1290_v38 }
 0x11a   :  { %v704_v54 = vsel %vm644_vm2, %v675_v10, 2147483647  ;;  %v708_v53 = vsel %vm648_vm3, %v679_v41, 2147483647  ;;  %v712_v8 = vsel %vm652_vm4, %v682_v59, 2147483647  ;;  %vm642_vm10 = vcmp.eq.f32.partialorder %v1173_v32, %v1290_v38 }
 0x11b   :  { %v716_v63 = vsel %vm656_vm5, %v686_v20, 2147483647  ;;  %v720_v7 = vsel %vm660_vm6, %v689_v23, 2147483647  ;;  %v724_v19 = vsel %vm664_vm7, %v693_v42, 2147483647  ;;  %vm643_vm11 = vcmp.eq.f32.partialorder %v1167_v21, %v1290_v38 }
 0x11c   :  { %v728_v0 = vsel %vm668_vm8, %v696_v3, 2147483647  ;;  %v732_v34 = vsel %vm672_vm9, %v700_v31, 2147483647  ;;  %v737_v56 = vsel %vm1534_vm1, %v704_v54, 2147483647  ;;  %vm645_vm12 = vcmp.eq.f32.partialorder %v1178_v45, %v1290_v38 }
 0x11d   :  { %v745_v35 = vsel %vm1534_vm1, %v708_v53, 2147483647  ;;  %v757_v12 = vsel %vm1534_vm1, %v712_v8, 2147483647  ;;  %v769_v10 = vsel %vm1534_vm1, %v716_v63, 2147483647  ;;  %vm646_vm14 = vcmp.eq.f32.partialorder %v1196_v37, %v1290_v38 }
 0x11e   :  { %vm746_vm13 = vcmp.lt.s32.totalorder %v737_v56, %v745_v35  ;;  %v781_v23 = vsel %vm1534_vm1, %v720_v7, 2147483647  ;;  %v793_v41 = vsel %vm1534_vm1, %v724_v19, 2147483647  ;;  %v805_v57 = vsel %vm1534_vm1, %v728_v0, 2147483647 }
 0x11f   :  { %v747_v42 = vsel %vm746_vm13, %v737_v56, %v745_v35  ;;  %v1326_v59 = vsel %vm1534_vm1, %v732_v34, 2147483647  ;;  %vm647_vm15 = vcmp.eq.f32.partialorder %v1191_v24, %v1290_v38  ;;  %vm649_vm2 = vcmp.eq.f32.partialorder %v1201_v52, %v1290_v38 }
 0x120   :  { %vm758_vm0 = vcmp.lt.s32.totalorder %v747_v42, %v757_v12  ;;  %vm650_vm3 = vcmp.eq.f32.partialorder %v1220_v5, %v1290_v38  ;;  %vm651_vm4 = vcmp.eq.f32.partialorder %v1215_v49, %v1290_v38  ;;  %vm665_vm9 = vcmp.eq.f32.partialorder %v1204_v62, %v1290_v38 }
 0x121   :  { %v759_v3 = vsel %vm758_vm0, %v747_v42, %v757_v12  ;;  %vm666_vm13 = vcmp.eq.f32.partialorder %v1222_v6, %v1290_v38  ;;  %vm667_vm1 = vcmp.eq.f32.partialorder %v1217_v50, %v1290_v38  ;;  %vm670_vm6 = vcmp.eq.f32.partialorder %v1250_v48, %v1290_v38 }
 0x122   :  { %vm770_vm8 = vcmp.lt.s32.totalorder %v759_v3, %v769_v10  ;;  %vm671_vm7 = vcmp.eq.f32.partialorder %v1241_v28, %v1290_v38  ;;  %v702_v8 = vsel %vm642_vm10, %v1165_v55, 2147483647  ;;  %v703_v20 = vsel %vm643_vm11, %v674_v60, 2147483647  ;;  %v1395_v60 = vld [vmem:[#allocation2] sm:$0x1] }
 0x123   :  { %v771_v7 = vsel %vm770_vm8, %v759_v3, %v769_v10  ;;  %vm669_vm8 = vcmp.eq.f32.partialorder %v1227_v15, %v1290_v38  ;;  %v705_v31 = vsel %vm645_vm12, %v676_v1, 2147483647  ;;  %v706_v32 = vsel %vm646_vm14, %v677_v27, 2147483647 }
 0x124   :  { %vm782_vm5 = vcmp.lt.s32.totalorder %v771_v7, %v781_v23  ;;  %v707_v21 = vsel %vm647_vm15, %v678_v25, 2147483647  ;;  %v709_v45 = vsel %vm649_vm2, %v680_v30, 2147483647  ;;  %v710_v37 = vsel %vm650_vm3, %v1262_v11, 2147483647 }
 0x125   :  { %v783_v19 = vsel %vm782_vm5, %v771_v7, %v781_v23  ;;  %v711_v24 = vsel %vm651_vm4, %v681_v43, 2147483647  ;;  %vm1535_vm11 = vcmp.eq.f32.partialorder %v1225_v14, %v1290_v38  ;;  %vm1536_vm12 = vcmp.eq.f32.partialorder %v1247_v40, %v1290_v38 }
 0x126   :  { %vm794_vm0 = vcmp.lt.s32.totalorder %v783_v19, %v793_v41  ;;  %v713_v55 = vsel %vm1535_vm11, %v683_v47, 2147483647  ;;  %v714_v5 = vsel %vm1536_vm12, %v684_v17, 2147483647  ;;  %vm1537_vm14 = vcmp.eq.f32.partialorder %v1238_v13, %v1290_v38 }
 0x127   :  { %v795_v54 = vsel %vm794_vm0, %v783_v19, %v793_v41  ;;  %v715_v49 = vsel %vm1537_vm14, %v685_v4, 2147483647  ;;  %vm1538_vm15 = vcmp.eq.f32.partialorder %v1256_v2, %v1290_v38  ;;  %vm673_vm2 = vcmp.eq.f32.partialorder %v1268_v18, %v1290_v38 }
 0x128   :  { %vm806_vm10 = vcmp.lt.s32.totalorder %v795_v54, %v805_v57  ;;  %v717_v14 = vsel %vm1538_vm15, %v687_v44, 2147483647  ;;  %vm1539_vm3 = vcmp.eq.f32.partialorder %v1175_v33, %v1290_v38  ;;  %vm1540_vm4 = vcmp.eq.f32.partialorder %v1169_v22, %v1290_v38 }
 0x129   :  { %v807_v52 = vsel %vm806_vm10, %v795_v54, %v805_v57  ;;  %v718_v40 = vsel %vm1539_vm3, %v1245_v39, 2147483647  ;;  %v719_v13 = vsel %vm1540_vm4, %v688_v61, 2147483647  ;;  %vm1541_vm5 = vcmp.eq.f32.partialorder %v1180_v46, %v1290_v38 }
 0x12a   :  { %v721_v1 = vsel %vm1541_vm5, %v690_v9, 2147483647  ;;  %vm818_vm0 = vcmp.lt.s32.totalorder %v807_v52, %v1326_v59  ;;  %vm1542_vm10 = vcmp.eq.f32.partialorder %v1199_v51, %v1290_v38  ;;  %vm1543_vm11 = vcmp.eq.f32.partialorder %v1194_v36, %v1290_v38 }
 0x12b   :  { %v722_v33 = vsel %vm1542_vm10, %v691_v29, 2147483647  ;;  %v723_v22 = vsel %vm1543_vm11, %v692_v26, 2147483647  ;;  %v1544_v61 = vrot.slane %v1245_v39, 7  ;;  %v1545_v51 = vrot.slane %v1265_v16, 1 }
 0x12c   :  { %v726_v2 = vsel %vm666_vm13, %v1265_v16, 2147483647  ;;  %v729_v36 = vsel %vm669_vm8, %v697_v58, 2147483647  ;;  %v1546_v62 = vrot.slane %v1265_v16, 4  ;;  %v1547_v39 = vrot.slane %v1265_v16, 5 }
 0x12d   :  { %v725_v46 = vsel %vm665_vm9, %v1544_v61, 2147483647  ;;  %v727_v9 = vsel %vm667_vm1, %v1545_v51, 2147483647  ;;  %vm830_vm9 = vcmp.gt.f32.partialorder %v1290_v38, %v1395_v60  ;;  %v1548_v11 = vrot.slane %v1265_v16, 7 }
 0x12e   :  { %v730_v6 = vsel %vm670_vm6, %v1546_v62, 2147483647  ;;  %v731_v50 = vsel %vm671_vm7, %v1547_v39, 2147483647  ;;  %v831_v15 = vsel %vm830_vm9, %v1290_v38, %v1395_v60  ;;  %vm1549_vm1 = vcmask 1040384  }
 0x12f   :  { %v1486_v18 = vsel %vm673_vm2, %v1548_v11, 2147483647  ;;  %v735_v25 = vsel %vm1549_vm1, %v702_v8, 2147483647  ;;  %vm1550_vm13 = vmmov %vm1549_vm1  ;;  %832 = vst [vmem:[#allocation2] sm:$0x1] %v831_v15  ;;  %v1502_v29 = vsel %vm818_vm0, %v807_v52, %v1326_v59 }
 0x130   :  { %v736_v48 = vsel %vm1550_vm13, %v703_v20, 2147483647  ;;  %vm1551_vm6 = vmmov %vm1549_vm1  ;;  %v763_v17 = vsel %vm1549_vm1, %v714_v5, 2147483647  ;;  %v790_v19 = vsel %vm1549_vm1, %v723_v22, 2147483647 }
 0x131   :  { %v738_v26 = vsel %vm1551_vm6, %v705_v31, 2147483647  ;;  %vm1552_vm8 = vmmov %vm1549_vm1  ;;  %v833_v22 = vld [vmem:[#allocation3] sm:$0x1] }
 0x132   :  { %v739_v28 = vsel %vm1552_vm8, %v706_v32, 2147483647  ;;  %vm1553_vm7 = vmmov %vm1549_vm1 }
 0x133   :  { %v742_v27 = vsel %vm1553_vm7, %v707_v21, 2147483647  ;;  %vm1554_vm12 = vmmov %vm1549_vm1  ;;  %vm740_vm14 = vcmp.lt.s32.totalorder %v735_v25, %v739_v28 }
 0x134   :  { %v748_v16 = vsel %vm1554_vm12, %v709_v45, 2147483647  ;;  %vm743_vm15 = vcmp.lt.s32.totalorder %v736_v48, %v742_v27  ;;  %vm1555_vm3 = vmmov %vm1549_vm1  ;;  %v741_v43 = vsel %vm740_vm14, %v735_v25, %v739_v28 }
 0x135   :  { %vm749_vm2 = vcmp.lt.s32.totalorder %v738_v26, %v748_v16  ;;  %v751_v30 = vsel %vm1555_vm3, %v710_v37, 2147483647  ;;  %v744_v44 = vsel %vm743_vm15, %v736_v48, %v742_v27  ;;  %vm1556_vm4 = vmmov %vm1549_vm1 }
 0x136   :  { %v750_v47 = vsel %vm749_vm2, %v738_v26, %v748_v16  ;;  %v754_v58 = vsel %vm1556_vm4, %v711_v24, 2147483647  ;;  %vm752_vm5 = vcmp.lt.s32.totalorder %v741_v43, %v751_v30  ;;  %vm1557_vm11 = vmmov %vm1549_vm1 }
 0x137   :  { %vm755_vm10 = vcmp.lt.s32.totalorder %v744_v44, %v754_v58  ;;  %v760_v4 = vsel %vm1557_vm11, %v713_v55, 2147483647  ;;  %v753_v53 = vsel %vm752_vm5, %v741_v43, %v751_v30  ;;  %vm1558_vm13 = vmmov %vm1549_vm1 }
 0x138   :  { %v756_v63 = vsel %vm755_vm10, %v744_v44, %v754_v58  ;;  %vm761_vm0 = vcmp.lt.s32.totalorder %v750_v47, %v760_v4  ;;  %v766_v0 = vsel %vm1558_vm13, %v715_v49, 2147483647  ;;  %vm764_vm6 = vcmp.lt.s32.totalorder %v753_v53, %v763_v17  ;;  %vm1559_vm7 = vmmov %vm1549_vm1 }
 0x139   :  { %v762_v34 = vsel %vm761_vm0, %v750_v47, %v760_v4  ;;  %vm767_vm8 = vcmp.lt.s32.totalorder %v756_v63, %v766_v0  ;;  %v772_v56 = vsel %vm1559_vm7, %v717_v14, 2147483647  ;;  %v765_v35 = vsel %vm764_vm6, %v753_v53, %v763_v17  ;;  %vm1560_vm14 = vmmov %vm1549_vm1 }
 0x13a   :  { %v768_v12 = vsel %vm767_vm8, %v756_v63, %v766_v0  ;;  %vm773_vm12 = vcmp.lt.s32.totalorder %v762_v34, %v772_v56  ;;  %v775_v10 = vsel %vm1560_vm14, %v718_v40, 2147483647  ;;  %vm1561_vm2 = vmmov %vm1549_vm1 }
 0x13b   :  { %v774_v23 = vsel %vm773_vm12, %v762_v34, %v772_v56  ;;  %vm776_vm15 = vcmp.lt.s32.totalorder %v765_v35, %v775_v10  ;;  %v778_v41 = vsel %vm1561_vm2, %v719_v13, 2147483647  ;;  %vm1562_vm3 = vmmov %vm1549_vm1 }
 0x13c   :  { %v784_v42 = vsel %vm1562_vm3, %v721_v1, 2147483647  ;;  %v777_v57 = vsel %vm776_vm15, %v765_v35, %v775_v10  ;;  %vm779_vm4 = vcmp.lt.s32.totalorder %v768_v12, %v778_v41  ;;  %vm1563_vm10 = vmmov %vm1549_vm1 }
 0x13d   :  { %vm785_vm5 = vcmp.lt.s32.totalorder %v774_v23, %v784_v42  ;;  %v787_v59 = vsel %vm1563_vm10, %v722_v33, 2147483647  ;;  %v780_v3 = vsel %vm779_vm4, %v768_v12, %v778_v41  ;;  %vm1564_vm13 = vmmov %vm1549_vm1 }
 0x13e   :  { %v786_v7 = vsel %vm785_vm5, %v774_v23, %v784_v42  ;;  %vm788_vm11 = vcmp.lt.s32.totalorder %v777_v57, %v787_v59  ;;  %vm791_vm0 = vcmp.lt.s32.totalorder %v780_v3, %v790_v19  ;;  %v796_v20 = vsel %vm1564_vm13, %v725_v46, 2147483647  ;;  %vm1565_vm6 = vmmov %vm1549_vm1 }
 0x13f   :  { %v789_v8 = vsel %vm788_vm11, %v777_v57, %v787_v59  ;;  %v799_v31 = vsel %vm1565_vm6, %v726_v2, 2147483647  ;;  %v792_v54 = vsel %vm791_vm0, %v780_v3, %v790_v19  ;;  %vm797_vm8 = vcmp.lt.s32.totalorder %v786_v7, %v796_v20  ;;  %vm1566_vm12 = vmmov %vm1549_vm1 }
 0x140   :  { %vm800_vm7 = vcmp.lt.s32.totalorder %v789_v8, %v799_v31  ;;  %v802_v32 = vsel %vm1566_vm12, %v727_v9, 2147483647  ;;  %v798_v21 = vsel %vm797_vm8, %v786_v7, %v796_v20  ;;  %vm1567_vm15 = vmmov %vm1549_vm1 }
 0x141   :  { %v801_v45 = vsel %vm800_vm7, %v789_v8, %v799_v31  ;;  %vm803_vm14 = vcmp.lt.s32.totalorder %v792_v54, %v802_v32  ;;  %v808_v37 = vsel %vm1567_vm15, %v729_v36, 2147483647  ;;  %vm1568_vm3 = vmmov %vm1549_vm1 }
 0x142   :  { %v804_v24 = vsel %vm803_vm14, %v792_v54, %v802_v32  ;;  %vm809_vm2 = vcmp.lt.s32.totalorder %v798_v21, %v808_v37  ;;  %v811_v55 = vsel %vm1568_vm3, %v730_v6, 2147483647  ;;  %vm1569_vm4 = vmmov %vm1549_vm1 }
 0x143   :  { %v814_v52 = vsel %vm1569_vm4, %v731_v50, 2147483647  ;;  %v810_v5 = vsel %vm809_vm2, %v798_v21, %v808_v37  ;;  %vm812_vm5 = vcmp.lt.s32.totalorder %v801_v45, %v811_v55  ;;  %vm1570_vm11 = vmmov %vm1549_vm1 }
 0x144   :  { %vm815_vm10 = vcmp.lt.s32.totalorder %v804_v24, %v814_v52  ;;  %v820_v49 = vsel %vm1570_vm11, %v1486_v18, 2147483647  ;;  %v813_v14 = vsel %vm812_vm5, %v801_v45, %v811_v55 }
 0x145   :  { %v816_v40 = vsel %vm815_vm10, %v804_v24, %v814_v52  ;;  %vm821_vm1 = vcmp.lt.s32.totalorder %v810_v5, %v820_v49 }
 0x146   :  { %v822_v13 = vsel %vm821_vm1, %v810_v5, %v820_v49  ;;  %vm823_vm0 = vcmp.lt.s32.totalorder %v813_v14, %v816_v40 }
 0x147   :  { %v824_v1 = vsel %vm823_vm0, %v813_v14, %v816_v40  ;;  %vm825_vm13 = vcmp.lt.s32.totalorder %v1502_v29, %v822_v13 }
 0x148   :  { %v826_v33 = vsel %vm825_vm13, %v1502_v29, %v822_v13 }
 0x149   :  { %vm827_vm6 = vcmp.lt.s32.totalorder %v824_v1, %v826_v33 }
 0x14a   :  { %v828_v61 = vsel %vm827_vm6, %v824_v1, %v826_v33 }
 0x14b   :  { %v834_v46 = vsel %vm830_vm9, %v828_v61, %v833_v22 }
 0x14c   :  { %835 = vst [vmem:[#allocation3] sm:$0x1] %v834_v46 }
 0x14d   :  { %996 = shalt.err (!%p993_p4)
}
 0x14e   :  { %845 = dma.vmem_to_hbm [thread:$0]  %s843_s0, 16, %s1533_s2, [#allocation4]  }
 0x14f   :  { %1005 = dma.done.wait [#allocation4], 16  }
 0x150   :  { %1006 = vsyncadd [#allocation4], 4294967280 }
 0x151   :  { %849 = vsyncpa [#allocation4], 1 }

</bundles_post_ra>
